<compile_context>
chip_gen: v6e
topology: v6e:2x2x1
jax: 0.10.0
libtpu: 0.0.40
codegen_flags: <defaults>
</compile_context>

<pallas_src>
import functools

import jax
import jax.numpy as jnp
from jax.experimental import pallas as pl
from jax.experimental.pallas import tpu as pltpu


def _mlp_kernel(x_ref, w1_ref, b1_ref, w2_ref, b2_ref, w3_ref, b3_ref, o_ref):
    # fc1 + relu  (bf16 operands on the MXU, f32 accumulation / elementwise)
    h1 = jnp.dot(x_ref[...].astype(jnp.bfloat16), w1_ref[...],
                 preferred_element_type=jnp.float32)
    h1 = jnp.maximum(h1 + b1_ref[...], 0.0)
    # fc2 + relu
    h2 = jnp.dot(h1.astype(jnp.bfloat16), w2_ref[...],
                 preferred_element_type=jnp.float32)
    h2 = jnp.maximum(h2 + b2_ref[...], 0.0)
    # out (no activation)
    out = jnp.dot(h2.astype(jnp.bfloat16), w3_ref[...],
                  preferred_element_type=jnp.float32) + b3_ref[...]
    o_ref[...] = out.astype(o_ref.dtype)


@functools.partial(jax.jit, static_argnames=("tile_b",))
def dueling_dqn_forward(x, w1, b1, w2, b2, w3, b3, *, tile_b=128):
    """x: (B, D_in) f32; wi: (in, out) bf16; bi: (1, out) f32. -> (B, n_actions) f32."""
    B, d_in = x.shape
    n_actions = w3.shape[1]

    # Lane-pad the output side to a multiple of 128 (dense stores instead of
    # 4/128-lane masked stores); zero columns are sliced away afterwards.
    n_pad = 128 * pl.cdiv(n_actions, 128)
    w3p = jnp.pad(w3, ((0, 0), (0, n_pad - n_actions)))
    b3p = jnp.pad(b3, ((0, 0), (0, n_pad - n_actions)))

    # Pad batch up to a multiple of the batch tile.
    B_pad = tile_b * pl.cdiv(B, tile_b)
    x_pad = jnp.pad(x, ((0, B_pad - B), (0, 0)))

    # Full-array (VMEM-resident) spec for weights / biases: constant block index.
    full = lambda a: pl.BlockSpec(a.shape, lambda i: (0,) * a.ndim)

    out = pl.pallas_call(
        _mlp_kernel,
        out_shape=jax.ShapeDtypeStruct((B_pad, n_pad), jnp.float32),
        grid_spec=pltpu.PrefetchScalarGridSpec(
            num_scalar_prefetch=0,
            grid=(B_pad // tile_b,),
            in_specs=[
                pl.BlockSpec((tile_b, d_in), lambda i: (i, 0)),  # activation tile
                full(w1), full(b1),
                full(w2), full(b2),
                full(w3p), full(b3p),
            ],
            out_specs=pl.BlockSpec((tile_b, n_pad), lambda i: (i, 0)),
        ),
        compiler_params=pltpu.CompilerParams(
            dimension_semantics=("parallel",),   # megacore sharding on v7x
        ),
    )(x_pad, w1, b1, w2, b2, w3p, b3p)

    return out[:B, :n_actions]


def init_params(key, input_dims, fc1, fc2, n_actions):
    """PyTorch-Linear-style uniform fan-in init; weights bf16, biases f32."""
    ks = jax.random.split(key, 6)

    def lin(kw, kb, fan_in, fan_out):
        bound = 1.0 / jnp.sqrt(fan_in)
        w = jax.random.uniform(kw, (fan_in, fan_out), jnp.float32, -bound, bound)
        b = jax.random.uniform(kb, (1, fan_out), jnp.float32, -bound, bound)
        return w.astype(jnp.bfloat16), b

    w1, b1 = lin(ks[0], ks[1], input_dims, fc1)
    w2, b2 = lin(ks[2], ks[3], fc1, fc2)
    w3, b3 = lin(ks[4], ks[5], fc2, n_actions)
    return w1, b1, w2, b2, w3, b3


def _reference_forward(x, w1, b1, w2, b2, w3, b3):
    """Plain-JAX reference matching the kernel's bf16-operand / f32-accum math."""
    f32 = jnp.float32
    xb = x.astype(jnp.bfloat16).astype(f32)
    h1 = jnp.maximum(xb @ w1.astype(f32) + b1, 0.0)
    h1b = h1.astype(jnp.bfloat16).astype(f32)
    h2 = jnp.maximum(h1b @ w2.astype(f32) + b2, 0.0)
    h2b = h2.astype(jnp.bfloat16).astype(f32)
    return h2b @ w3.astype(f32) + b3


if __name__ == "__main__":
    key = jax.random.PRNGKey(0)
    # Small-but-gridded example: 256 states -> 2 grid steps of TILE_B=128.
    batch, input_dims, fc1, fc2, n_actions = 256, 8, 256, 256, 4

    k_x, k_p = jax.random.split(key)
    x = jax.random.normal(k_x, (batch, input_dims), jnp.float32)
    params = init_params(k_p, input_dims, fc1, fc2, n_actions)

    out = dueling_dqn_forward(x, *params)
    out = jax.block_until_ready(out)

    ref = _reference_forward(x, *params)
    assert out.shape == (batch, n_actions)
    assert jnp.allclose(out, ref, atol=1e-3, rtol=1e-3), (
        float(jnp.max(jnp.abs(out - ref))))

    print("KERNEL_OK")
</pallas_src>

<mosaic_0001>
module attributes {stable_mosaic.version = 11 : i64} {
  func.func @_mlp_kernel(%arg0: i32, %arg1: memref<128x8xf32, #tpu.memory_space<vmem>>, %arg2: memref<8x256xbf16, #tpu.memory_space<vmem>>, %arg3: memref<1x256xf32, #tpu.memory_space<vmem>>, %arg4: memref<256x256xbf16, #tpu.memory_space<vmem>>, %arg5: memref<1x256xf32, #tpu.memory_space<vmem>>, %arg6: memref<256x128xbf16, #tpu.memory_space<vmem>>, %arg7: memref<1x128xf32, #tpu.memory_space<vmem>>, %arg8: memref<128x128xf32, #tpu.memory_space<vmem>>) attributes {dimension_semantics = [#tpu.dimension_semantics<parallel>], iteration_bounds = array<i64: 2>, scalar_prefetch = 0 : i64, scratch_operands = 0 : i64, tpu.core_type = #tpu.core_type<tc>, window_params = [{transform_indices = @transform_0, window_bounds = array<i64: 128, 8>}, {pipeline_mode = #tpu.pipeline_mode<synchronous>, transform_indices = @transform_1, window_bounds = array<i64: 8, 256>}, {pipeline_mode = #tpu.pipeline_mode<synchronous>, transform_indices = @transform_2, window_bounds = array<i64: 1, 256>}, {pipeline_mode = #tpu.pipeline_mode<synchronous>, transform_indices = @transform_3, window_bounds = array<i64: 256, 256>}, {pipeline_mode = #tpu.pipeline_mode<synchronous>, transform_indices = @transform_4, window_bounds = array<i64: 1, 256>}, {pipeline_mode = #tpu.pipeline_mode<synchronous>, transform_indices = @transform_5, window_bounds = array<i64: 256, 128>}, {pipeline_mode = #tpu.pipeline_mode<synchronous>, transform_indices = @transform_6, window_bounds = array<i64: 1, 128>}, {transform_indices = @transform_7, window_bounds = array<i64: 128, 128>}]} {
    %c0 = arith.constant 0 : index
    %c0_0 = arith.constant 0 : index
    %0 = vector.load %arg1[%c0, %c0_0] : memref<128x8xf32, #tpu.memory_space<vmem>>, vector<128x8xf32>
    %1 = arith.truncf %0 : vector<128x8xf32> to vector<128x8xbf16>
    %c0_1 = arith.constant 0 : index
    %c0_2 = arith.constant 0 : index
    %2 = vector.load %arg2[%c0_1, %c0_2] : memref<8x256xbf16, #tpu.memory_space<vmem>>, vector<8x256xbf16>
    %cst = arith.constant dense<0.000000e+00> : vector<128x256xf32>
    %3 = tpu.matmul %1, %2, %cst {dimension_numbers = #tpu.dot_dimension_numbers<[1], [0], [0], [1], [0, 0, 1, 1], [], []>} : vector<128x8xbf16>, vector<8x256xbf16>, vector<128x256xf32> -> vector<128x256xf32>
    %c0_3 = arith.constant 0 : index
    %c0_4 = arith.constant 0 : index
    %4 = vector.load %arg3[%c0_3, %c0_4] : memref<1x256xf32, #tpu.memory_space<vmem>>, vector<1x256xf32>
    %5 = vector.broadcast %4 : vector<1x256xf32> to vector<128x256xf32>
    %6 = arith.addf %3, %5 : vector<128x256xf32>
    %cst_5 = arith.constant 0.000000e+00 : f32
    %7 = vector.broadcast %cst_5 : f32 to vector<128x256xf32>
    %8 = arith.maximumf %6, %7 : vector<128x256xf32>
    %9 = arith.truncf %8 : vector<128x256xf32> to vector<128x256xbf16>
    %c0_6 = arith.constant 0 : index
    %c0_7 = arith.constant 0 : index
    %10 = vector.load %arg4[%c0_6, %c0_7] : memref<256x256xbf16, #tpu.memory_space<vmem>>, vector<256x256xbf16>
    %cst_8 = arith.constant dense<0.000000e+00> : vector<128x256xf32>
    %11 = tpu.matmul %9, %10, %cst_8 {dimension_numbers = #tpu.dot_dimension_numbers<[1], [0], [0], [1], [0, 0, 1, 1], [], []>} : vector<128x256xbf16>, vector<256x256xbf16>, vector<128x256xf32> -> vector<128x256xf32>
    %c0_9 = arith.constant 0 : index
    %c0_10 = arith.constant 0 : index
    %12 = vector.load %arg5[%c0_9, %c0_10] : memref<1x256xf32, #tpu.memory_space<vmem>>, vector<1x256xf32>
    %13 = vector.broadcast %12 : vector<1x256xf32> to vector<128x256xf32>
    %14 = arith.addf %11, %13 : vector<128x256xf32>
    %cst_11 = arith.constant 0.000000e+00 : f32
    %15 = vector.broadcast %cst_11 : f32 to vector<128x256xf32>
    %16 = arith.maximumf %14, %15 : vector<128x256xf32>
    %17 = arith.truncf %16 : vector<128x256xf32> to vector<128x256xbf16>
    %c0_12 = arith.constant 0 : index
    %c0_13 = arith.constant 0 : index
    %18 = vector.load %arg6[%c0_12, %c0_13] : memref<256x128xbf16, #tpu.memory_space<vmem>>, vector<256x128xbf16>
    %cst_14 = arith.constant dense<0.000000e+00> : vector<128x128xf32>
    %19 = tpu.matmul %17, %18, %cst_14 {dimension_numbers = #tpu.dot_dimension_numbers<[1], [0], [0], [1], [0, 0, 1, 1], [], []>} : vector<128x256xbf16>, vector<256x128xbf16>, vector<128x128xf32> -> vector<128x128xf32>
    %c0_15 = arith.constant 0 : index
    %c0_16 = arith.constant 0 : index
    %20 = vector.load %arg7[%c0_15, %c0_16] : memref<1x128xf32, #tpu.memory_space<vmem>>, vector<1x128xf32>
    %21 = vector.broadcast %20 : vector<1x128xf32> to vector<128x128xf32>
    %22 = arith.addf %19, %21 : vector<128x128xf32>
    %c0_17 = arith.constant 0 : index
    %c0_18 = arith.constant 0 : index
    %23 = vector.load %arg8[%c0_17, %c0_18] : memref<128x128xf32, #tpu.memory_space<vmem>>, vector<128x128xf32>
    tpu.vector_store %arg8[%c0_17, %c0_18], %22 {strides = array<i32>} : memref<128x128xf32, #tpu.memory_space<vmem>>, vector<128x128xf32>,
    return
  }
  func.func @transform_0(%arg0: i32) -> (i32, i32) {
    %c0_i32 = arith.constant 0 : i32
    %c0_i32_0 = arith.constant 0 : i32
    return %arg0, %c0_i32 : i32, i32
  }
  func.func @transform_1(%arg0: i32) -> (i32, i32) {
    %c0_i32 = arith.constant 0 : i32
    %c0_i32_0 = arith.constant 0 : i32
    %c0_i32_1 = arith.constant 0 : i32
    return %c0_i32, %c0_i32_0 : i32, i32
  }
  func.func @transform_2(%arg0: i32) -> (i32, i32) {
    %c0_i32 = arith.constant 0 : i32
    %c0_i32_0 = arith.constant 0 : i32
    %c0_i32_1 = arith.constant 0 : i32
    return %c0_i32, %c0_i32_0 : i32, i32
  }
  func.func @transform_3(%arg0: i32) -> (i32, i32) {
    %c0_i32 = arith.constant 0 : i32
    %c0_i32_0 = arith.constant 0 : i32
    %c0_i32_1 = arith.constant 0 : i32
    return %c0_i32, %c0_i32_0 : i32, i32
  }
  func.func @transform_4(%arg0: i32) -> (i32, i32) {
    %c0_i32 = arith.constant 0 : i32
    %c0_i32_0 = arith.constant 0 : i32
    %c0_i32_1 = arith.constant 0 : i32
    return %c0_i32, %c0_i32_0 : i32, i32
  }
  func.func @transform_5(%arg0: i32) -> (i32, i32) {
    %c0_i32 = arith.constant 0 : i32
    %c0_i32_0 = arith.constant 0 : i32
    %c0_i32_1 = arith.constant 0 : i32
    return %c0_i32, %c0_i32_0 : i32, i32
  }
  func.func @transform_6(%arg0: i32) -> (i32, i32) {
    %c0_i32 = arith.constant 0 : i32
    %c0_i32_0 = arith.constant 0 : i32
    %c0_i32_1 = arith.constant 0 : i32
    return %c0_i32, %c0_i32_0 : i32, i32
  }
  func.func @transform_7(%arg0: i32) -> (i32, i32) {
    %c0_i32 = arith.constant 0 : i32
    %c0_i32_0 = arith.constant 0 : i32
    return %arg0, %c0_i32 : i32, i32
  }
}

</mosaic_0001>

<bundles_post_ra>
// kernel: dueling_dqn_forward.1
= control target key start
LH: loop header
LB: loop body
LE: loop exit
PB: predicated region body
PF: predicated region fallthrough
CT: control target
= control target key end

     0   :  { %s1446_s24 = smov 0   ;;  %s1780_s0 = inlined_call_operand.vmem [shape: f32[256,8], index: 0, kind: input, shape index: {}]   ;;  %s1781_s1 = inlined_call_operand.vmem [shape: bf16[8,256], index: 1, kind: input, shape index: {}]   ;;  %s1782_s2 = inlined_call_operand.vmem [shape: f32[1,256], index: 2, kind: input, shape index: {}]   ;;  %s1783_s3 = inlined_call_operand.vmem [shape: bf16[256,256], index: 3, kind: input, shape index: {}]   ;;  %s1784_s4 = inlined_call_operand.vmem [shape: f32[1,256], index: 4, kind: input, shape index: {}]   ;;  %s1785_s5 = inlined_call_operand.vmem [shape: bf16[256,128], index: 5, kind: input, shape index: {}]   ;;  %s1786_s6 = inlined_call_operand.vmem [shape: f32[1,128], index: 6, kind: input, shape index: {}]   ;;  %s1787_s7 = inlined_call_operand.vmem [shape: f32[256,128], index: 7, kind: output, shape index: {}]  }
   0x1 LB: > { %s1187_s25 = sadd.s32 4294967295, %s1403_s24   ;;  %p1191_p0 = scmp.ge.s32.totalorder %s1403_s24, 1  ;;  %s1403_s24 = sphi %s1446_s24, %s17_s24  }
   0x2   : > { %p238_p1 = scmp.lt.s32.totalorder %s1403_s24, 3 }
   0x4   : > { %p239_p2 = pnand %p1191_p0, %p238_p1 }
   0x5   : > { %s1192_s28 = sshll.u32 (!%p239_p2), %s1187_s25, 4 }
   0x6   : > { %242 = sbr.rel (%p239_p2) target bundleno = 690 (0x2b2), region = 48  ;;  %p271_p3 = scmp.lt.s32.totalorder (!%p239_p2), %s1192_s28, 31 }
   0xb   : > { %v307_v0 = vld [vmem:[%s1781_s1] sm:$0xff]  ;;  %vm350_vm0 = vcmask 1043456   ;;  %v1405_v3 = vmov 0   ;;  %v1333_v4 = vld [vmem:[%s1783_s3 + $0x74] ss:$8 sps:$4 sm:$0xff]   ;;  %s1789_s28 = smov (!%p271_p3, %s1192_s28), 31 }
   0xc   : > { %v1197_v1 = vcombine.high %v307_v0, %v307_v0  ;;  %v1196_v2 = vcombine.low %v307_v0, %v307_v0  ;;  %389 = vmatprep.mubr.bf16.mxu0 %v1405_v3  ;;  %v1335_v5 = vld [vmem:[%s1783_s3 + $0x70] ss:$8 sps:$4 sm:$0xff]   ;;  %v1336_v6 = vld [vmem:[%s1783_s3 + $0x64] ss:$8 sps:$4 sm:$0xff]   ;;  %722 = vmatprep.subr.bf16.mxu1 %v1333_v4  ;;  %v1338_v8 = vld [vmem:[%s1783_s3 + $0x60] ss:$8 sps:$4 sm:$0xff]  }
   0xd   : > { %723 = vmatpush1.bf16.msra.mxu1 %v1335_v5  ;;  %s1193_s14 = sshll.u32 %s1789_s28, 3  ;;  %v1339_v9 = vld [vmem:[%s1783_s3 + $0x54] ss:$8 sps:$4 sm:$0xff]   ;;  %vm325_vm1 = vcmask 64512   ;;  %v1341_v13 = vld [vmem:[%s1783_s3 + $0x50] ss:$8 sps:$4 sm:$0xff]  }
   0xe   : > { %1198 = vmatprep.subr.msk.bf16.mxu0 %vm350_vm0, %v1197_v1  ;;  %v352_v7 = vsel %vm350_vm0, %v1196_v2, 0  ;;  %724 = vmatprep.subr.bf16.mxu1 %v1336_v6  ;;  %s1481_s19 = scalar_lea.vmem %s1780_s0, %s1193_s14  ;;  %v1342_v14 = vld [vmem:[%s1783_s3 + $0x44] ss:$8 sps:$4 sm:$0xff]   ;;  %v1344_v17 = vld [vmem:[%s1783_s3 + $0x40] ss:$8 sps:$4 sm:$0xff]   ;;  %v1381_v61 = vld [vmem:[%s1785_s5 + $0x78] sm:$0xff]   ;;  %s1743_s15 = scalar_lea.vmem %s1787_s7, %s1193_s14 }
   0xf   : > { %372 = vmatpush1.bf16.msra.mxu0 %v352_v7  ;;  %v283_v10 = vld [vmem:[%s1481_s19] sm:$0xff]  ;;  %v284_v11 = vld [vmem:[%s1481_s19 + $0x8] sm:$0xff]  ;;  %v285_v15 = vld [vmem:[%s1481_s19 + $0x10] sm:$0xff] }
  0x10   : > { %v299_v12 = vpack.c.bf16 %v284_v11, %v283_v10  ;;  %v286_v16 = vld [vmem:[%s1481_s19 + $0x18] sm:$0xff]  ;;  %v1348_v21 = vld [vmem:[%s1783_s3 + $0x24] ss:$8 sps:$4 sm:$0xff]   ;;  %v1350_v24 = vld [vmem:[%s1783_s3 + $0x20] ss:$8 sps:$4 sm:$0xff]   ;;  %1258 = vmatprep.subr.bf16.mxu0 %v1381_v61  ;;  %v310_v11 = vlaneseq }
  0x11   : > { %725 = vmatpush1.bf16.msra.mxu1 %v1338_v8  ;;  %v1345_v18 = vld [vmem:[%s1783_s3 + $0x34] ss:$8 sps:$4 sm:$0xff]   ;;  %v300_v19 = vpack.c.bf16 %v286_v16, %v285_v15  ;;  %v1347_v20 = vld [vmem:[%s1783_s3 + $0x30] ss:$8 sps:$4 sm:$0xff]   ;;  %v287_v22 = vld [vmem:[%s1481_s19 + $0x20] sm:$0xff] }
  0x12   : > { %726 = vmatprep.subr.bf16.mxu1 %v1339_v9  ;;  %1199 = vmatmul.mubr.msk.bf16.vlgmr.msra.gmra.mxu0 %vm325_vm1, %v299_v12  ;;  %v288_v23 = vld [vmem:[%s1481_s19 + $0x28] sm:$0xff]  ;;  %v1351_v25 = vld [vmem:[%s1783_s3 + $0x14] ss:$8 sps:$4 sm:$0xff]   ;;  %v1353_v27 = vld [vmem:[%s1783_s3 + $0x10] ss:$8 sps:$4 sm:$0xff]   ;;  %v1637_v12 = vshrl.u32 %v310_v11, 7 }
  0x13   : > { %399 = vmatprep.mubr.bf16.mxu0 %v1405_v3  ;;  %v301_v26 = vpack.c.bf16 %v288_v23, %v287_v22  ;;  %v1354_v28 = vld [vmem:[%s1783_s3 + $0x4] ss:$8 sps:$4 sm:$0xff]   ;;  %v289_v29 = vld [vmem:[%s1481_s19 + $0x30] sm:$0xff]  ;;  %v290_v30 = vld [vmem:[%s1481_s19 + $0x38] sm:$0xff] }
  0x14   : > { %v1356_v31 = vld [vmem:[%s1783_s3] ss:$8 sps:$4 sm:$0xff]   ;;  %v1357_v32 = vld [vmem:[%s1783_s3 + $0xf4] ss:$8 sps:$4 sm:$0xff]   ;;  %v302_v33 = vpack.c.bf16 %v290_v30, %v289_v29  ;;  %v1359_v34 = vld [vmem:[%s1783_s3 + $0xf0] ss:$8 sps:$4 sm:$0xff]  }
  0x15   : > { %727 = vmatpush1.bf16.msra.mxu1 %v1341_v13  ;;  %v1360_v35 = vld [vmem:[%s1783_s3 + $0xe4] ss:$8 sps:$4 sm:$0xff]   ;;  %v1362_v38 = vld [vmem:[%s1783_s3 + $0xe0] ss:$8 sps:$4 sm:$0xff]   ;;  %v1363_v39 = vld [vmem:[%s1783_s3 + $0xd4] ss:$8 sps:$4 sm:$0xff]  }
  0x16   : > { %728 = vmatprep.subr.bf16.mxu1 %v1342_v14  ;;  %v291_v36 = vld [vmem:[%s1481_s19 + $0x40] sm:$0xff]  ;;  %v292_v37 = vld [vmem:[%s1481_s19 + $0x48] sm:$0xff]  ;;  %v1365_v41 = vld [vmem:[%s1783_s3 + $0xd0] ss:$8 sps:$4 sm:$0xff]   ;;  %v316_v13 = vsub.s32 1, %v1637_v12  ;;  %v312_v14 = vsub.s32 0, %v1637_v12 }
  0x17   : > { %v303_v40 = vpack.c.bf16 %v292_v37, %v291_v36  ;;  %v1366_v42 = vld [vmem:[%s1783_s3 + $0xc4] ss:$8 sps:$4 sm:$0xff]   ;;  %v293_v43 = vld [vmem:[%s1481_s19 + $0x50] sm:$0xff]  ;;  %v294_v44 = vld [vmem:[%s1481_s19 + $0x58] sm:$0xff] }
  0x18   : > { %v1368_v45 = vld [vmem:[%s1783_s3 + $0xc0] ss:$8 sps:$4 sm:$0xff]   ;;  %v1369_v46 = vld [vmem:[%s1783_s3 + $0xb4] ss:$8 sps:$4 sm:$0xff]   ;;  %v304_v47 = vpack.c.bf16 %v294_v44, %v293_v43  ;;  %v1371_v48 = vld [vmem:[%s1783_s3 + $0xb0] ss:$8 sps:$4 sm:$0xff]  }
  0x19   : > { %729 = vmatpush1.bf16.msra.mxu1 %v1344_v17  ;;  %v295_v49 = vld [vmem:[%s1481_s19 + $0x60] sm:$0xff]  ;;  %v296_v50 = vld [vmem:[%s1481_s19 + $0x68] sm:$0xff]  ;;  %v297_v52 = vld [vmem:[%s1481_s19 + $0x70] sm:$0xff] }
  0x1a   : > { %730 = vmatprep.subr.bf16.mxu1 %v1345_v18  ;;  %1200 = vmatmul.mubr.msk.bf16.gmra.mxu0 %vm325_vm1, %v300_v19  ;;  %v305_v51 = vpack.c.bf16 %v296_v50, %v295_v49  ;;  %v298_v53 = vld [vmem:[%s1481_s19 + $0x78] sm:$0xff]  ;;  %v1372_v55 = vld [vmem:[%s1783_s3 + $0xa4] ss:$8 sps:$4 sm:$0xff]   ;;  %v1374_v56 = vld [vmem:[%s1783_s3 + $0xa0] ss:$8 sps:$4 sm:$0xff]  }
  0x1b   : > { %409 = vmatprep.mubr.bf16.mxu0 %v1405_v3  ;;  %v306_v54 = vpack.c.bf16 %v298_v53, %v297_v52  ;;  %v1375_v57 = vld [vmem:[%s1783_s3 + $0x94] ss:$8 sps:$4 sm:$0xff]   ;;  %v1377_v58 = vld [vmem:[%s1783_s3 + $0x90] ss:$8 sps:$4 sm:$0xff]   ;;  %v1378_v59 = vld [vmem:[%s1783_s3 + $0x84] ss:$8 sps:$4 sm:$0xff]  }
  0x1c   : > { %v1380_v60 = vld [vmem:[%s1783_s3 + $0x80] ss:$8 sps:$4 sm:$0xff]   ;;  %v1382_v62 = vld [vmem:[%s1785_s5 + $0x38] sm:$0xff]   ;;  %v1383_v63 = vld [vmem:[%s1785_s5 + $0x70] sm:$0xff]  }
  0x1d   : > { %731 = vmatpush1.bf16.msra.mxu1 %v1347_v20  ;;  %1259 = vmatpush3.bf16.msra.mxu0 %v1382_v62  ;;  %v1384_v0 = vld [vmem:[%s1785_s5 + $0x30] sm:$0xff]   ;;  %v1385_v1 = vld [vmem:[%s1785_s5 + $0x68] sm:$0xff]   ;;  %v1388_v4 = vld [vmem:[%s1785_s5 + $0x20] sm:$0xff]  }
  0x1e   : > { %732 = vmatprep.subr.bf16.mxu1 %v1348_v21  ;;  %1260 = vmatprep.subr.bf16.mxu0 %v1383_v63  ;;  %v1386_v2 = vld [vmem:[%s1785_s5 + $0x28] sm:$0xff]   ;;  %v1389_v5 = vld [vmem:[%s1785_s5 + $0x58] sm:$0xff]   ;;  %v1391_v7 = vld [vmem:[%s1785_s5 + $0x50] sm:$0xff]  }
  0x1f   : > { %v1390_v6 = vld [vmem:[%s1785_s5 + $0x18] sm:$0xff]   ;;  %v1392_v8 = vld [vmem:[%s1785_s5 + $0x10] sm:$0xff]   ;;  %v1393_v9 = vld [vmem:[%s1785_s5 + $0x48] sm:$0xff]  }
  0x20   : > { %v1394_v10 = vld [vmem:[%s1785_s5 + $0x8] sm:$0xff]   ;;  %v308_v15 = vld [vmem:[%s1782_s2] sm:$0x3] }
  0x21   : > { %733 = vmatpush1.bf16.msra.mxu1 %v1350_v24  ;;  %1261 = vmatpush3.bf16.msra.mxu0 %v1384_v0  ;;  %v1646_v17 = vrot.slane %v308_v15, %v316_v13  ;;  %v1650_v18 = vrot.slane %v308_v15, %v312_v14 }
  0x22   : > { %734 = vmatprep.subr.bf16.mxu1 %v1351_v25  ;;  %1201 = vmatmul.mubr.msk.bf16.gmra.mxu0 %vm325_vm1, %v301_v26 }
  0x23   : > { %419 = vmatprep.mubr.bf16.mxu0 %v1405_v3  ;;  %1262 = vmatprep.subr.bf16.mxu0 %v1385_v1 }
  0x25   : > { %735 = vmatpush1.bf16.msra.mxu1 %v1353_v27  ;;  %1263 = vmatpush3.bf16.msra.mxu0 %v1386_v2 }
  0x26   : > { %736 = vmatprep.subr.bf16.mxu1 %v1354_v28 }
  0x29   : > { %737 = vmatpush1.bf16.msra.mxu1 %v1356_v31 }
  0x2a   : > { %738 = vmatprep.subr.bf16.mxu1 %v1357_v32  ;;  %1202 = vmatmul.mubr.msk.bf16.gmra.mxu0 %vm325_vm1, %v302_v33 }
  0x2b   : > { %429 = vmatprep.mubr.bf16.mxu0 %v1405_v3 }
  0x2d   : > { %739 = vmatpush2.bf16.msra.mxu1 %v1359_v34 }
  0x2e   : > { %740 = vmatprep.subr.bf16.mxu1 %v1360_v35 }
  0x31   : > { %741 = vmatpush2.bf16.msra.mxu1 %v1362_v38 }
  0x32   : > { %742 = vmatprep.subr.bf16.mxu1 %v1363_v39  ;;  %1203 = vmatmul.mubr.msk.bf16.gmra.mxu0 %vm325_vm1, %v303_v40 }
  0x33   : > { %439 = vmatprep.mubr.bf16.mxu0 %v1405_v3 }
  0x35   : > { %743 = vmatpush2.bf16.msra.mxu1 %v1365_v41 }
  0x36   : > { %744 = vmatprep.subr.bf16.mxu1 %v1366_v42 }
  0x39   : > { %745 = vmatpush2.bf16.msra.mxu1 %v1368_v45 }
  0x3a   : > { %746 = vmatprep.subr.bf16.mxu1 %v1369_v46  ;;  %1204 = vmatmul.mubr.msk.bf16.gmra.mxu0 %vm325_vm1, %v304_v47 }
  0x3b   : > { %449 = vmatprep.mubr.bf16.mxu0 %v1405_v3 }
  0x3d   : > { %747 = vmatpush2.bf16.msra.mxu1 %v1371_v48 }
  0x3e   : > { %748 = vmatprep.subr.bf16.mxu1 %v1372_v55 }
  0x41   : > { %749 = vmatpush2.bf16.msra.mxu1 %v1374_v56 }
  0x42   : > { %1205 = vmatmul.mubr.msk.bf16.gmra.mxu0 %vm325_vm1, %v305_v51  ;;  %750 = vmatprep.subr.bf16.mxu1 %v1375_v57 }
  0x43   : > { %459 = vmatprep.mubr.bf16.mxu0 %v1405_v3  ;;  %v1387_v3 = vld [vmem:[%s1785_s5 + $0x60] sm:$0xff]  }
  0x44   : > { %1264 = vmatprep.subr.bf16.mxu0 %v1387_v3 }
  0x45   : > { %751 = vmatpush2.bf16.msra.mxu1 %v1377_v58  ;;  %1265 = vmatpush3.bf16.msra.mxu0 %v1388_v4 }
  0x46   : > { %752 = vmatprep.subr.bf16.mxu1 %v1378_v59  ;;  %1266 = vmatprep.subr.bf16.mxu0 %v1389_v5 }
  0x49   : > { %753 = vmatpush2.bf16.msra.mxu1 %v1380_v60  ;;  %1267 = vmatpush3.bf16.msra.mxu0 %v1390_v6 }
  0x4a   : > { %1206 = vmatmul.mubr.msk.bf16.gmra.mxu0 %vm325_vm1, %v306_v54  ;;  %1268 = vmatprep.subr.bf16.mxu0 %v1391_v7 }
  0x4d   : > { %1269 = vmatpush3.bf16.msra.mxu0 %v1392_v8 }
  0x4e   : > { %1270 = vmatprep.subr.bf16.mxu0 %v1393_v9 }
  0x51   : > { %1271 = vmatpush3.bf16.msra.mxu0 %v1394_v10 }
  0xd2   : > { %v391_v16 = vpop.f32.mrf.mxu0 }
  0xd3   : > { %v392_v23 = vadd.f32 %v391_v16, %v1650_v18 }
  0xd4   : > { %v393_v19 = vpop.f32.mrf.mxu0 }
  0xd5   : > { %v394_v21 = vadd.f32 %v393_v19, %v1646_v17  ;;  %v470_v30 = vmax.f32 %v392_v23, 0.0 }
  0xd6   : > { %v395_v20 = vpop.f32.mrf.mxu0 }
  0xd7   : > { %v396_v22 = vadd.f32 %v395_v20, %v1650_v18  ;;  %v471_v28 = vmax.f32 %v394_v21, 0.0 }
  0xd8   : > { %v397_v24 = vpop.f32.mrf.mxu0 }
  0xd9   : > { %v398_v25 = vadd.f32 %v397_v24, %v1646_v17  ;;  %v472_v26 = vmax.f32 %v396_v22, 0.0 }
  0xda   : > { %v401_v27 = vpop.f32.mrf.mxu0 }
  0xdb   : > { %v473_v29 = vmax.f32 %v398_v25, 0.0  ;;  %v502_v33 = vpack.c.bf16 %v472_v26, %v470_v30  ;;  %v402_v37 = vadd.f32 %v401_v27, %v1650_v18 }
  0xdc   : > { %v403_v31 = vpop.f32.mrf.mxu0 }
  0xdd   : > { %v503_v32 = vpack.c.bf16 %v473_v29, %v471_v28  ;;  %v404_v35 = vadd.f32 %v403_v31, %v1646_v17  ;;  %v474_v44 = vmax.f32 %v402_v37, 0.0 }
  0xde   : > { %v405_v34 = vpop.f32.mrf.mxu0 }
  0xdf   : > { %v406_v36 = vadd.f32 %v405_v34, %v1650_v18  ;;  %754 = vmatprep.mubr.bf16.mxu1 %v503_v32  ;;  %v475_v42 = vmax.f32 %v404_v35, 0.0 }
  0xe0   : > { %v407_v38 = vpop.f32.mrf.mxu0  ;;  %755 = vmatmul.mubr.bf16.vlgmr.msra.gmra.mxu1 %v502_v33 }
  0xe1   : > { %v408_v39 = vadd.f32 %v407_v38, %v1646_v17  ;;  %v476_v40 = vmax.f32 %v406_v36, 0.0 }
  0xe2   : > { %v411_v41 = vpop.f32.mrf.mxu0 }
  0xe3   : > { %v477_v43 = vmax.f32 %v408_v39, 0.0  ;;  %v504_v47 = vpack.c.bf16 %v476_v40, %v474_v44  ;;  %v412_v51 = vadd.f32 %v411_v41, %v1650_v18 }
  0xe4   : > { %v413_v45 = vpop.f32.mrf.mxu0 }
  0xe5   : > { %v505_v46 = vpack.c.bf16 %v477_v43, %v475_v42  ;;  %v414_v49 = vadd.f32 %v413_v45, %v1646_v17  ;;  %v478_v58 = vmax.f32 %v412_v51, 0.0 }
  0xe6   : > { %v415_v48 = vpop.f32.mrf.mxu0 }
  0xe7   : > { %v416_v50 = vadd.f32 %v415_v48, %v1650_v18  ;;  %764 = vmatprep.mubr.bf16.mxu1 %v505_v46  ;;  %v479_v56 = vmax.f32 %v414_v49, 0.0 }
  0xe8   : > { %v417_v52 = vpop.f32.mrf.mxu0  ;;  %765 = vmatmul.mubr.bf16.gmra.mxu1 %v504_v47 }
  0xe9   : > { %v418_v53 = vadd.f32 %v417_v52, %v1646_v17  ;;  %v480_v54 = vmax.f32 %v416_v50, 0.0 }
  0xea   : > { %v421_v55 = vpop.f32.mrf.mxu0 }
  0xeb   : > { %v481_v57 = vmax.f32 %v418_v53, 0.0  ;;  %v506_v61 = vpack.c.bf16 %v480_v54, %v478_v58  ;;  %v422_v1 = vadd.f32 %v421_v55, %v1650_v18 }
  0xec   : > { %v423_v59 = vpop.f32.mrf.mxu0 }
  0xed   : > { %v507_v60 = vpack.c.bf16 %v481_v57, %v479_v56  ;;  %v424_v63 = vadd.f32 %v423_v59, %v1646_v17  ;;  %v482_v8 = vmax.f32 %v422_v1, 0.0 }
  0xee   : > { %v425_v62 = vpop.f32.mrf.mxu0 }
  0xef   : > { %v426_v0 = vadd.f32 %v425_v62, %v1650_v18  ;;  %774 = vmatprep.mubr.bf16.mxu1 %v507_v60  ;;  %v483_v6 = vmax.f32 %v424_v63, 0.0 }
  0xf0   : > { %v427_v2 = vpop.f32.mrf.mxu0  ;;  %775 = vmatmul.mubr.bf16.gmra.mxu1 %v506_v61 }
  0xf1   : > { %v428_v3 = vadd.f32 %v427_v2, %v1646_v17  ;;  %v484_v4 = vmax.f32 %v426_v0, 0.0 }
  0xf2   : > { %v431_v5 = vpop.f32.mrf.mxu0 }
  0xf3   : > { %v485_v7 = vmax.f32 %v428_v3, 0.0  ;;  %v508_v11 = vpack.c.bf16 %v484_v4, %v482_v8  ;;  %v432_v20 = vadd.f32 %v431_v5, %v1650_v18 }
  0xf4   : > { %v433_v9 = vpop.f32.mrf.mxu0 }
  0xf5   : > { %v509_v10 = vpack.c.bf16 %v485_v7, %v483_v6  ;;  %v434_v16 = vadd.f32 %v433_v9, %v1646_v17  ;;  %v486_v27 = vmax.f32 %v432_v20, 0.0  ;;  %v1395_v7 = vld [vmem:[%s1785_s5 + $0x40] sm:$0xff]  }
  0xf6   : > { %v435_v15 = vpop.f32.mrf.mxu0  ;;  %1272 = vmatprep.subr.bf16.mxu0 %v1395_v7 }
  0xf7   : > { %v436_v19 = vadd.f32 %v435_v15, %v1650_v18  ;;  %784 = vmatprep.mubr.bf16.mxu1 %v509_v10  ;;  %v487_v25 = vmax.f32 %v434_v16, 0.0 }
  0xf8   : > { %v437_v21 = vpop.f32.mrf.mxu0  ;;  %785 = vmatmul.mubr.bf16.gmra.mxu1 %v508_v11 }
  0xf9   : > { %v438_v22 = vadd.f32 %v437_v21, %v1646_v17  ;;  %v488_v23 = vmax.f32 %v436_v19, 0.0 }
  0xfa   : > { %v441_v24 = vpop.f32.mrf.mxu0 }
  0xfb   : > { %v489_v26 = vmax.f32 %v438_v22, 0.0  ;;  %v510_v30 = vpack.c.bf16 %v488_v23, %v486_v27  ;;  %v442_v34 = vadd.f32 %v441_v24, %v1650_v18 }
  0xfc   : > { %v443_v28 = vpop.f32.mrf.mxu0 }
  0xfd   : > { %v511_v29 = vpack.c.bf16 %v489_v26, %v487_v25  ;;  %v444_v32 = vadd.f32 %v443_v28, %v1646_v17  ;;  %v490_v41 = vmax.f32 %v442_v34, 0.0 }
  0xfe   : > { %v445_v31 = vpop.f32.mrf.mxu0 }
  0xff   : > { %v446_v33 = vadd.f32 %v445_v31, %v1650_v18  ;;  %794 = vmatprep.mubr.bf16.mxu1 %v511_v29  ;;  %v491_v39 = vmax.f32 %v444_v32, 0.0 }
 0x100   : > { %v447_v35 = vpop.f32.mrf.mxu0  ;;  %795 = vmatmul.mubr.bf16.gmra.mxu1 %v510_v30 }
 0x101   : > { %v448_v36 = vadd.f32 %v447_v35, %v1646_v17  ;;  %v492_v37 = vmax.f32 %v446_v33, 0.0 }
 0x102   : > { %v451_v38 = vpop.f32.mrf.mxu0 }
 0x103   : > { %v493_v40 = vmax.f32 %v448_v36, 0.0  ;;  %v512_v44 = vpack.c.bf16 %v492_v37, %v490_v41  ;;  %v452_v48 = vadd.f32 %v451_v38, %v1650_v18 }
 0x104   : > { %v453_v42 = vpop.f32.mrf.mxu0 }
 0x105   : > { %v513_v43 = vpack.c.bf16 %v493_v40, %v491_v39  ;;  %v454_v46 = vadd.f32 %v453_v42, %v1646_v17  ;;  %v494_v55 = vmax.f32 %v452_v48, 0.0 }
 0x106   : > { %v455_v45 = vpop.f32.mrf.mxu0 }
 0x107   : > { %v456_v47 = vadd.f32 %v455_v45, %v1650_v18  ;;  %804 = vmatprep.mubr.bf16.mxu1 %v513_v43  ;;  %v495_v53 = vmax.f32 %v454_v46, 0.0 }
 0x108   : > { %v457_v49 = vpop.f32.mrf.mxu0  ;;  %805 = vmatmul.mubr.bf16.gmra.mxu1 %v512_v44 }
 0x109   : > { %v458_v50 = vadd.f32 %v457_v49, %v1646_v17  ;;  %v496_v51 = vmax.f32 %v456_v47, 0.0 }
 0x10a   : > { %v461_v52 = vpop.f32.mrf.mxu0 }
 0x10b   : > { %v497_v54 = vmax.f32 %v458_v50, 0.0  ;;  %v514_v58 = vpack.c.bf16 %v496_v51, %v494_v55  ;;  %v462_v62 = vadd.f32 %v461_v52, %v1650_v18 }
 0x10c   : > { %v463_v56 = vpop.f32.mrf.mxu0 }
 0x10d   : > { %v515_v57 = vpack.c.bf16 %v497_v54, %v495_v53  ;;  %v464_v60 = vadd.f32 %v463_v56, %v1646_v17  ;;  %v498_v4 = vmax.f32 %v462_v62, 0.0 }
 0x10e   : > { %v465_v59 = vpop.f32.mrf.mxu0 }
 0x10f   : > { %v466_v61 = vadd.f32 %v465_v59, %v1650_v18  ;;  %814 = vmatprep.mubr.bf16.mxu1 %v515_v57  ;;  %v499_v2 = vmax.f32 %v464_v60, 0.0  ;;  %v1396_v18 = vld [vmem:[%s1785_s5] sm:$0xff]  }
 0x110   : > { %v467_v63 = vpop.f32.mrf.mxu0  ;;  %815 = vmatmul.mubr.bf16.gmra.mxu1 %v514_v58  ;;  %1273 = vmatpush3.bf16.msra.mxu0 %v1396_v18 }
 0x111   : > { %v468_v0 = vadd.f32 %v467_v63, %v1646_v17  ;;  %v500_v1 = vmax.f32 %v466_v61, 0.0  ;;  %v550_v17 = vld [vmem:[%s1784_s4] sm:$0x3] }
 0x112   : > { %v1695_v9 = vrot.slane %v550_v17, %v316_v13  ;;  %v1699_v10 = vrot.slane %v550_v17, %v312_v14 }
 0x113   : > { %v501_v3 = vmax.f32 %v468_v0, 0.0  ;;  %v516_v6 = vpack.c.bf16 %v500_v1, %v498_v4 }
 0x115   : > { %v517_v5 = vpack.c.bf16 %v501_v3, %v499_v2 }
 0x117   : > { %824 = vmatprep.mubr.bf16.mxu1 %v517_v5 }
 0x118   : > { %825 = vmatmul.mubr.bf16.gmra.mxu1 %v516_v6 }
 0x1a0   : > { %v756_v8 = vpop.f32.mrf.mxu1 }
 0x1a1   : > { %v757_v20 = vadd.f32 %v756_v8, %v1699_v10 }
 0x1a2   : > { %v758_v11 = vpop.f32.mrf.mxu1 }
 0x1a3   : > { %v759_v16 = vadd.f32 %v758_v11, %v1695_v9  ;;  %v835_v26 = vmax.f32 %v757_v20, 0.0 }
 0x1a4   : > { %v760_v15 = vpop.f32.mrf.mxu1 }
 0x1a5   : > { %v761_v19 = vadd.f32 %v760_v15, %v1699_v10  ;;  %v836_v25 = vmax.f32 %v759_v16, 0.0 }
 0x1a6   : > { %v762_v21 = vpop.f32.mrf.mxu1 }
 0x1a7   : > { %v763_v22 = vadd.f32 %v762_v21, %v1695_v9  ;;  %v837_v23 = vmax.f32 %v761_v19, 0.0 }
 0x1a8   : > { %v766_v24 = vpop.f32.mrf.mxu1 }
 0x1a9   : > { %v838_v13 = vmax.f32 %v763_v22, 0.0  ;;  %v867_v14 = vpack.c.bf16 %v837_v23, %v835_v26  ;;  %v767_v31 = vadd.f32 %v766_v24, %v1699_v10 }
 0x1aa   : > { %v768_v27 = vpop.f32.mrf.mxu1 }
 0x1ab   : > { %v868_v12 = vpack.c.bf16 %v838_v13, %v836_v25  ;;  %v769_v29 = vadd.f32 %v768_v27, %v1695_v9  ;;  %v839_v38 = vmax.f32 %v767_v31, 0.0 }
 0x1ac   : > { %v770_v28 = vpop.f32.mrf.mxu1 }
 0x1ad   : > { %v771_v30 = vadd.f32 %v770_v28, %v1699_v10  ;;  %1050 = vmatprep.mubr.bf16.mxu0 %v868_v12  ;;  %v840_v36 = vmax.f32 %v769_v29, 0.0 }
 0x1ae   : > { %v772_v32 = vpop.f32.mrf.mxu1  ;;  %1051 = vmatmul.mubr.bf16.vlgmr.msra.gmra.mxu0 %v867_v14 }
 0x1af   : > { %v773_v33 = vadd.f32 %v772_v32, %v1695_v9  ;;  %v841_v34 = vmax.f32 %v771_v30, 0.0 }
 0x1b0   : > { %v776_v35 = vpop.f32.mrf.mxu1 }
 0x1b1   : > { %v842_v37 = vmax.f32 %v773_v33, 0.0  ;;  %v869_v41 = vpack.c.bf16 %v841_v34, %v839_v38  ;;  %v777_v45 = vadd.f32 %v776_v35, %v1699_v10 }
 0x1b2   : > { %v778_v39 = vpop.f32.mrf.mxu1 }
 0x1b3   : > { %v870_v40 = vpack.c.bf16 %v842_v37, %v840_v36  ;;  %v779_v43 = vadd.f32 %v778_v39, %v1695_v9  ;;  %v843_v52 = vmax.f32 %v777_v45, 0.0 }
 0x1b4   : > { %v780_v42 = vpop.f32.mrf.mxu1 }
 0x1b5   : > { %v781_v44 = vadd.f32 %v780_v42, %v1699_v10  ;;  %1058 = vmatprep.mubr.bf16.mxu0 %v870_v40  ;;  %v844_v50 = vmax.f32 %v779_v43, 0.0 }
 0x1b6   : > { %v782_v46 = vpop.f32.mrf.mxu1  ;;  %1059 = vmatmul.mubr.bf16.gmra.mxu0 %v869_v41 }
 0x1b7   : > { %v783_v47 = vadd.f32 %v782_v46, %v1695_v9  ;;  %v845_v48 = vmax.f32 %v781_v44, 0.0 }
 0x1b8   : > { %v786_v49 = vpop.f32.mrf.mxu1 }
 0x1b9   : > { %v846_v51 = vmax.f32 %v783_v47, 0.0  ;;  %v871_v55 = vpack.c.bf16 %v845_v48, %v843_v52  ;;  %v787_v59 = vadd.f32 %v786_v49, %v1699_v10 }
 0x1ba   : > { %v788_v53 = vpop.f32.mrf.mxu1 }
 0x1bb   : > { %v872_v54 = vpack.c.bf16 %v846_v51, %v844_v50  ;;  %v789_v57 = vadd.f32 %v788_v53, %v1695_v9  ;;  %v847_v2 = vmax.f32 %v787_v59, 0.0 }
 0x1bc   : > { %v790_v56 = vpop.f32.mrf.mxu1 }
 0x1bd   : > { %v791_v58 = vadd.f32 %v790_v56, %v1699_v10  ;;  %1066 = vmatprep.mubr.bf16.mxu0 %v872_v54  ;;  %v848_v0 = vmax.f32 %v789_v57, 0.0 }
 0x1be   : > { %v792_v60 = vpop.f32.mrf.mxu1  ;;  %1067 = vmatmul.mubr.bf16.gmra.mxu0 %v871_v55 }
 0x1bf   : > { %v793_v61 = vadd.f32 %v792_v60, %v1695_v9  ;;  %v849_v62 = vmax.f32 %v791_v58, 0.0 }
 0x1c0   : > { %v796_v63 = vpop.f32.mrf.mxu1 }
 0x1c1   : > { %v850_v1 = vmax.f32 %v793_v61, 0.0  ;;  %v873_v5 = vpack.c.bf16 %v849_v62, %v847_v2  ;;  %v797_v17 = vadd.f32 %v796_v63, %v1699_v10  ;;  %v1736_v63 = vld [vmem:[%s1786_s6] ss:$0 sm:$0xff] }
 0x1c2   : > { %v798_v3 = vpop.f32.mrf.mxu1 }
 0x1c3   : > { %v874_v4 = vpack.c.bf16 %v850_v1, %v848_v0  ;;  %v799_v7 = vadd.f32 %v798_v3, %v1695_v9  ;;  %v851_v21 = vmax.f32 %v797_v17, 0.0 }
 0x1c4   : > { %v800_v6 = vpop.f32.mrf.mxu1 }
 0x1c5   : > { %v801_v18 = vadd.f32 %v800_v6, %v1699_v10  ;;  %1074 = vmatprep.mubr.bf16.mxu0 %v874_v4  ;;  %v852_v19 = vmax.f32 %v799_v7, 0.0 }
 0x1c6   : > { %v802_v8 = vpop.f32.mrf.mxu1  ;;  %1075 = vmatmul.mubr.bf16.gmra.mxu0 %v873_v5 }
 0x1c7   : > { %v803_v11 = vadd.f32 %v802_v8, %v1695_v9  ;;  %v853_v15 = vmax.f32 %v801_v18, 0.0 }
 0x1c8   : > { %v806_v16 = vpop.f32.mrf.mxu1 }
 0x1c9   : > { %v854_v20 = vmax.f32 %v803_v11, 0.0  ;;  %v875_v24 = vpack.c.bf16 %v853_v15, %v851_v21  ;;  %v807_v27 = vadd.f32 %v806_v16, %v1699_v10 }
 0x1ca   : > { %v808_v22 = vpop.f32.mrf.mxu1 }
 0x1cb   : > { %v876_v23 = vpack.c.bf16 %v854_v20, %v852_v19  ;;  %v809_v13 = vadd.f32 %v808_v22, %v1695_v9  ;;  %v855_v32 = vmax.f32 %v807_v27, 0.0 }
 0x1cc   : > { %v810_v25 = vpop.f32.mrf.mxu1 }
 0x1cd   : > { %v811_v26 = vadd.f32 %v810_v25, %v1699_v10  ;;  %1082 = vmatprep.mubr.bf16.mxu0 %v876_v23  ;;  %v856_v30 = vmax.f32 %v809_v13, 0.0 }
 0x1ce   : > { %v812_v12 = vpop.f32.mrf.mxu1  ;;  %1083 = vmatmul.mubr.bf16.gmra.mxu0 %v875_v24 }
 0x1cf   : > { %v813_v14 = vadd.f32 %v812_v12, %v1695_v9  ;;  %v857_v28 = vmax.f32 %v811_v26, 0.0 }
 0x1d0   : > { %v816_v29 = vpop.f32.mrf.mxu1 }
 0x1d1   : > { %v858_v31 = vmax.f32 %v813_v14, 0.0  ;;  %v877_v35 = vpack.c.bf16 %v857_v28, %v855_v32  ;;  %v817_v39 = vadd.f32 %v816_v29, %v1699_v10 }
 0x1d2   : > { %v818_v33 = vpop.f32.mrf.mxu1 }
 0x1d3   : > { %v878_v34 = vpack.c.bf16 %v858_v31, %v856_v30  ;;  %v819_v37 = vadd.f32 %v818_v33, %v1695_v9  ;;  %v859_v46 = vmax.f32 %v817_v39, 0.0 }
 0x1d4   : > { %v820_v36 = vpop.f32.mrf.mxu1 }
 0x1d5   : > { %v821_v38 = vadd.f32 %v820_v36, %v1699_v10  ;;  %1090 = vmatprep.mubr.bf16.mxu0 %v878_v34  ;;  %v860_v44 = vmax.f32 %v819_v37, 0.0 }
 0x1d6   : > { %v822_v40 = vpop.f32.mrf.mxu1  ;;  %1091 = vmatmul.mubr.bf16.gmra.mxu0 %v877_v35 }
 0x1d7   : > { %v823_v41 = vadd.f32 %v822_v40, %v1695_v9  ;;  %v861_v42 = vmax.f32 %v821_v38, 0.0 }
 0x1d8   : > { %v826_v43 = vpop.f32.mrf.mxu1 }
 0x1d9   : > { %v862_v45 = vmax.f32 %v823_v41, 0.0  ;;  %v879_v49 = vpack.c.bf16 %v861_v42, %v859_v46  ;;  %v827_v53 = vadd.f32 %v826_v43, %v1699_v10 }
 0x1da   : > { %v828_v47 = vpop.f32.mrf.mxu1 }
 0x1db   : > { %v880_v48 = vpack.c.bf16 %v862_v45, %v860_v44  ;;  %v829_v51 = vadd.f32 %v828_v47, %v1695_v9  ;;  %v863_v59 = vmax.f32 %v827_v53, 0.0 }
 0x1dc   : > { %v830_v50 = vpop.f32.mrf.mxu1 }
 0x1dd   : > { %v831_v52 = vadd.f32 %v830_v50, %v1699_v10  ;;  %1098 = vmatprep.mubr.bf16.mxu0 %v880_v48  ;;  %v864_v57 = vmax.f32 %v829_v51, 0.0 }
 0x1de   : > { %v832_v54 = vpop.f32.mrf.mxu1  ;;  %1099 = vmatmul.mubr.bf16.gmra.mxu0 %v879_v49 }
 0x1df   : > { %v833_v55 = vadd.f32 %v832_v54, %v1695_v9  ;;  %v865_v56 = vmax.f32 %v831_v52, 0.0 }
 0x1e1   : > { %v866_v58 = vmax.f32 %v833_v55, 0.0  ;;  %v881_v61 = vpack.c.bf16 %v865_v56, %v863_v59 }
 0x1e3   : > { %v882_v60 = vpack.c.bf16 %v866_v58, %v864_v57 }
 0x1e5   : > { %1106 = vmatprep.mubr.bf16.mxu0 %v882_v60 }
 0x1e6   : > { %1107 = vmatmul.mubr.bf16.gmra.mxu0 %v881_v61 }
 0x26e   : > { %v1274_v62 = vpop.f32.mrf.mxu0 }
 0x270   : > { %v1275_v10 = vpop.f32.mrf.mxu0 }
 0x271   : > { %v1276_v0 = vadd.f32 %v1275_v10, %v1274_v62 }
 0x272   : > { %v1277_v9 = vpop.f32.mrf.mxu0 }
 0x273   : > { %v1053_v1 = vadd.f32 %v1276_v0, %v1736_v63 }
 0x274   : > { %v1278_v2 = vpop.f32.mrf.mxu0 }
 0x275   : > { %1115 = vst [vmem:[%s1743_s15] sm:$0xff] %v1053_v1  ;;  %v1279_v3 = vadd.f32 %v1278_v2, %v1277_v9 }
 0x276   : > { %v1280_v4 = vpop.f32.mrf.mxu0 }
 0x277   : > { %v1056_v5 = vadd.f32 %v1279_v3, %v1736_v63 }
 0x278   : > { %v1281_v6 = vpop.f32.mrf.mxu0 }
 0x279   : > { %1116 = vst [vmem:[%s1743_s15 + $0x8] sm:$0xff] %v1056_v5  ;;  %v1282_v7 = vadd.f32 %v1281_v6, %v1280_v4 }
 0x27a   : > { %v1283_v18 = vpop.f32.mrf.mxu0 }
 0x27b   : > { %v1061_v17 = vadd.f32 %v1282_v7, %v1736_v63 }
 0x27c   : > { %v1284_v8 = vpop.f32.mrf.mxu0 }
 0x27d   : > { %1117 = vst [vmem:[%s1743_s15 + $0x10] sm:$0xff] %v1061_v17  ;;  %v1285_v11 = vadd.f32 %v1284_v8, %v1283_v18 }
 0x27e   : > { %v1286_v15 = vpop.f32.mrf.mxu0 }
 0x27f   : > { %v1064_v16 = vadd.f32 %v1285_v11, %v1736_v63 }
 0x280   : > { %v1287_v19 = vpop.f32.mrf.mxu0 }
 0x281   : > { %1118 = vst [vmem:[%s1743_s15 + $0x18] sm:$0xff] %v1064_v16  ;;  %v1288_v20 = vadd.f32 %v1287_v19, %v1286_v15 }
 0x282   : > { %v1289_v21 = vpop.f32.mrf.mxu0 }
 0x283   : > { %v1069_v22 = vadd.f32 %v1288_v20, %v1736_v63 }
 0x284   : > { %v1290_v23 = vpop.f32.mrf.mxu0 }
 0x285   : > { %1119 = vst [vmem:[%s1743_s15 + $0x20] sm:$0xff] %v1069_v22  ;;  %v1291_v24 = vadd.f32 %v1290_v23, %v1289_v21 }
 0x286   : > { %v1292_v25 = vpop.f32.mrf.mxu0 }
 0x287   : > { %v1072_v13 = vadd.f32 %v1291_v24, %v1736_v63 }
 0x288   : > { %v1293_v26 = vpop.f32.mrf.mxu0 }
 0x289   : > { %1120 = vst [vmem:[%s1743_s15 + $0x28] sm:$0xff] %v1072_v13  ;;  %v1294_v27 = vadd.f32 %v1293_v26, %v1292_v25 }
 0x28a   : > { %v1295_v12 = vpop.f32.mrf.mxu0 }
 0x28b   : > { %v1077_v14 = vadd.f32 %v1294_v27, %v1736_v63 }
 0x28c   : > { %v1296_v28 = vpop.f32.mrf.mxu0 }
 0x28d   : > { %1121 = vst [vmem:[%s1743_s15 + $0x30] sm:$0xff] %v1077_v14  ;;  %v1297_v29 = vadd.f32 %v1296_v28, %v1295_v12 }
 0x28e   : > { %v1298_v30 = vpop.f32.mrf.mxu0 }
 0x28f   : > { %v1080_v31 = vadd.f32 %v1297_v29, %v1736_v63 }
 0x290   : > { %v1299_v32 = vpop.f32.mrf.mxu0 }
 0x291   : > { %1122 = vst [vmem:[%s1743_s15 + $0x38] sm:$0xff] %v1080_v31  ;;  %v1300_v33 = vadd.f32 %v1299_v32, %v1298_v30 }
 0x292   : > { %v1301_v34 = vpop.f32.mrf.mxu0 }
 0x293   : > { %v1085_v35 = vadd.f32 %v1300_v33, %v1736_v63 }
 0x294   : > { %v1302_v36 = vpop.f32.mrf.mxu0 }
 0x295   : > { %1123 = vst [vmem:[%s1743_s15 + $0x40] sm:$0xff] %v1085_v35  ;;  %v1303_v37 = vadd.f32 %v1302_v36, %v1301_v34 }
 0x296   : > { %v1304_v38 = vpop.f32.mrf.mxu0 }
 0x297   : > { %v1088_v39 = vadd.f32 %v1303_v37, %v1736_v63 }
 0x298   : > { %v1305_v40 = vpop.f32.mrf.mxu0 }
 0x299   : > { %1124 = vst [vmem:[%s1743_s15 + $0x48] sm:$0xff] %v1088_v39  ;;  %v1306_v41 = vadd.f32 %v1305_v40, %v1304_v38 }
 0x29a   : > { %v1307_v42 = vpop.f32.mrf.mxu0 }
 0x29b   : > { %v1093_v43 = vadd.f32 %v1306_v41, %v1736_v63 }
 0x29c   : > { %v1308_v44 = vpop.f32.mrf.mxu0 }
 0x29d   : > { %1125 = vst [vmem:[%s1743_s15 + $0x50] sm:$0xff] %v1093_v43  ;;  %v1309_v45 = vadd.f32 %v1308_v44, %v1307_v42 }
 0x29e   : > { %v1310_v46 = vpop.f32.mrf.mxu0 }
 0x29f   : > { %v1096_v47 = vadd.f32 %v1309_v45, %v1736_v63 }
 0x2a0   : > { %v1311_v48 = vpop.f32.mrf.mxu0 }
 0x2a1   : > { %1126 = vst [vmem:[%s1743_s15 + $0x58] sm:$0xff] %v1096_v47  ;;  %v1312_v49 = vadd.f32 %v1311_v48, %v1310_v46 }
 0x2a2   : > { %v1313_v50 = vpop.f32.mrf.mxu0 }
 0x2a3   : > { %v1101_v51 = vadd.f32 %v1312_v49, %v1736_v63 }
 0x2a4   : > { %v1314_v52 = vpop.f32.mrf.mxu0 }
 0x2a5   : > { %1127 = vst [vmem:[%s1743_s15 + $0x60] sm:$0xff] %v1101_v51  ;;  %v1315_v53 = vadd.f32 %v1314_v52, %v1313_v50 }
 0x2a6   : > { %v1316_v54 = vpop.f32.mrf.mxu0 }
 0x2a7   : > { %v1104_v55 = vadd.f32 %v1315_v53, %v1736_v63 }
 0x2a8   : > { %v1317_v56 = vpop.f32.mrf.mxu0 }
 0x2a9   : > { %1128 = vst [vmem:[%s1743_s15 + $0x68] sm:$0xff] %v1104_v55  ;;  %v1318_v57 = vadd.f32 %v1317_v56, %v1316_v54 }
 0x2aa   : > { %v1319_v58 = vpop.f32.mrf.mxu0 }
 0x2ab   : > { %v1109_v59 = vadd.f32 %v1318_v57, %v1736_v63 }
 0x2ac   : > { %v1320_v60 = vpop.f32.mrf.mxu0 }
 0x2ad   : > { %1129 = vst [vmem:[%s1743_s15 + $0x70] sm:$0xff] %v1109_v59  ;;  %v1321_v61 = vadd.f32 %v1320_v60, %v1319_v58 }
 0x2af   : > { %v1112_v62 = vadd.f32 %v1321_v61, %v1736_v63 }
 0x2b1   : > { %1130 = vst [vmem:[%s1743_s15 + $0x78] sm:$0xff] %v1112_v62 }
 0x2b2 PF: > { %s17_s24 = sadd.s32 1, %s1403_s24  }
 0x2b3   : > { %p14_p4 = scmp.ge.s32.totalorder %s17_s24, 4  }
 0x2b5   :  { %16 = sbr.rel (!%p14_p4) target bundleno = 1 (0x1), region = 78 }

</bundles_post_ra>
